<compile_context>
chip_gen: v6e
topology: v6e:2x2x1
jax: 0.10.0
libtpu: 0.0.40
codegen_flags: <defaults>
</compile_context>

<pallas_src>
import functools

import jax
import jax.numpy as jnp
from jax.experimental import pallas as pl
from jax.experimental.pallas import tpu as pltpu


def _round_up(x, m):
    return ((x + m - 1) // m) * m


def _t5_layernorm_kernel(x_ref, w_ref, o_ref, *, eps, half_weight):
    # x_ref: (row_tile, hidden), w_ref: (1, hidden), o_ref: (row_tile, hidden)
    x = x_ref[...].astype(jnp.float32)
    # variance = mean(x^2) over the hidden (lane) axis, keepdims for broadcast.
    var = jnp.mean(x * x, axis=-1, keepdims=True)
    y = x * jax.lax.rsqrt(var + eps)
    if half_weight:
        # Torch T5LayerNorm cast order: cast the normalized activations to the
        # (half) weight dtype first, then multiply by the un-promoted weight.
        # Also saves 1-2 f32 VPU ops/element and halves the store width.
        o_ref[...] = (w_ref[...] * y.astype(o_ref.dtype)).astype(o_ref.dtype)
    else:
        o_ref[...] = (w_ref[...].astype(jnp.float32) * y).astype(o_ref.dtype)


def _pick_row_tile(rows, hidden, in_bytes, out_bytes, row_tile):
    # Sublane alignment depends on input element width (sub-32-bit dtypes pack
    # along sublanes).
    if in_bytes >= 4:
        align = 8
    elif in_bytes == 2:
        align = 16
    else:
        align = 32

    if row_tile is None:
        # Size by bytes: double-buffered input + output blocks plus ~3 live
        # f32 temporaries per element must stay well under the scoped VMEM
        # limit. This lands the input block around 3-5 MiB, which is already
        # at the flat part of the HBM-roofline tile sweep.
        vmem_block_budget = 32 * 1024 * 1024
        per_row = hidden * (2 * in_bytes + 2 * out_bytes + 3 * 4)
        row_tile = max(vmem_block_budget // per_row, align)

    row_tile = max(align, (row_tile // align) * align)

    if rows < align:
        # Tiny input: a block spanning all rows equals the full array dim,
        # which is always a legal block shape.
        return rows

    # Never make the tile larger than the (aligned) number of rows.
    row_tile = min(row_tile, _round_up(rows, align))

    # Give the single "parallel" grid axis a few steps whenever rows allow so
    # v7x's two TensorCores both get work and the prologue DMA overlaps with
    # compute; byte-sized tiles already give many steps on large inputs, this
    # only kicks in on small/medium ones (and is harmless on 1-TC v5e/v6e).
    target_steps = 4
    steps = min(target_steps, rows // align)
    if steps >= 2 and pl.cdiv(rows, row_tile) < steps:
        row_tile = _round_up(pl.cdiv(rows, steps), align)
    return row_tile


def _vmem_limit_bytes():
    # Generation-aware scoped-VMEM limit: 40 MiB on v7x (64 MiB physical),
    # 48 MiB on v5e/v6e (128 MiB physical). Blocks are sized to fit either way.
    try:
        cap = pltpu.get_tpu_info().vmem_capacity_bytes
    except Exception:
        cap = 64 * 1024 * 1024  # conservative (v7x) fallback
    return min(48 * 1024 * 1024, max(cap - 24 * 1024 * 1024, 32 * 1024 * 1024))


def t5_layer_norm(hidden_states, weight, eps=1e-6, row_tile=None):
    """T5-style RMS layer norm.

    hidden_states: (..., hidden)
    weight:        (hidden,)
    """
    orig_shape = hidden_states.shape
    hidden = orig_shape[-1]
    assert weight.shape == (hidden,)

    x2d = hidden_states.reshape(-1, hidden)
    rows = x2d.shape[0]

    # Output dtype follows torch T5LayerNorm semantics: cast to the weight
    # dtype when the weight is half precision, otherwise the f32-promoted
    # product dtype.
    half_weight = weight.dtype in (jnp.float16, jnp.bfloat16)
    if half_weight:
        out_dtype = weight.dtype
    else:
        out_dtype = jnp.promote_types(
            jnp.promote_types(hidden_states.dtype, weight.dtype), jnp.float32
        )

    in_bytes = jnp.dtype(hidden_states.dtype).itemsize
    out_bytes = jnp.dtype(out_dtype).itemsize
    row_tile = _pick_row_tile(rows, hidden, in_bytes, out_bytes, row_tile)

    # cdiv grid; the ragged last block (if any) is handled natively by Pallas:
    # rows are independent, so unspecified OOB reads are harmless and OOB
    # stores are masked. No host-side pad/slice (and their HBM copies).
    grid = pl.cdiv(rows, row_tile)

    w2d = weight.reshape(1, hidden)
    kernel = functools.partial(
        _t5_layernorm_kernel, eps=eps, half_weight=half_weight
    )

    # TODO(synk): for hidden < 128 (or not a 128-multiple) in production
    # shapes, fold rows into the lane dimension so stores are lane-dense and
    # avoid vst.msk; real T5 hidden sizes are already 128-multiples.
    out2d = pl.pallas_call(
        kernel,
        out_shape=jax.ShapeDtypeStruct((rows, hidden), out_dtype),
        grid_spec=pltpu.PrefetchScalarGridSpec(
            num_scalar_prefetch=0,
            grid=(grid,),
            in_specs=[
                pl.BlockSpec((row_tile, hidden), lambda i: (i, 0)),
                # Weight block is constant across the grid (index_map -> (0, 0)).
                pl.BlockSpec((1, hidden), lambda i: (0, 0)),
            ],
            out_specs=pl.BlockSpec((row_tile, hidden), lambda i: (i, 0)),
        ),
        compiler_params=pltpu.CompilerParams(
            dimension_semantics=("parallel",),
            vmem_limit_bytes=_vmem_limit_bytes(),
        ),
    )(x2d, w2d)

    return out2d.reshape(orig_shape)


def _reference(hidden_states, weight, eps):
    xf = hidden_states.astype(jnp.float32)
    var = jnp.mean(xf * xf, axis=-1, keepdims=True)
    y = xf * jax.lax.rsqrt(var + eps)
    if weight.dtype in (jnp.float16, jnp.bfloat16):
        y = y.astype(weight.dtype)
    return weight * y


if __name__ == "__main__":
    key = jax.random.PRNGKey(0)
    eps = 1e-6

    # Main check: batch=2, seq=8, hidden=32  (rows = 16 -> 2 grid steps)
    batch, seq, hidden = 2, 8, 32
    x = jax.random.normal(key, (batch, seq, hidden), dtype=jnp.float32)
    weight = jnp.ones((hidden,), dtype=jnp.float32)  # module init: torch.ones

    out = jax.block_until_ready(t5_layer_norm(x, weight, eps=eps))
    ref = _reference(x, weight, eps)
    assert out.shape == x.shape
    assert out.dtype == ref.dtype
    assert jnp.allclose(out, ref, atol=1e-5, rtol=1e-5)

    # Ragged-rows check: rows = 15 (not a multiple of the 8-row alignment);
    # exercises the native ragged-last-block path (no host pad/slice).
    x2 = jax.random.normal(jax.random.PRNGKey(1), (3, 5, hidden), dtype=jnp.float32)
    out2 = jax.block_until_ready(t5_layer_norm(x2, weight, eps=eps))
    ref2 = _reference(x2, weight, eps)
    assert out2.shape == x2.shape
    assert jnp.allclose(out2, ref2, atol=1e-5, rtol=1e-5)

    # Half-precision weight check (bf16 in / bf16 out, torch cast order).
    hidden_bf = 128
    x3 = jax.random.normal(
        jax.random.PRNGKey(2), (2, 8, hidden_bf), dtype=jnp.float32
    ).astype(jnp.bfloat16)
    w3 = jnp.ones((hidden_bf,), dtype=jnp.bfloat16)
    out3 = jax.block_until_ready(t5_layer_norm(x3, w3, eps=eps))
    ref3 = _reference(x3, w3, eps)
    assert out3.shape == x3.shape
    assert out3.dtype == jnp.bfloat16
    assert jnp.allclose(
        out3.astype(jnp.float32), ref3.astype(jnp.float32), atol=2e-2, rtol=2e-2
    )

    print("KERNEL_OK")
</pallas_src>

<mosaic_0001>
module attributes {stable_mosaic.version = 11 : i64} {
  func.func @_t5_layernorm_kernel(%arg0: i32, %arg1: memref<8x32xf32, #tpu.memory_space<vmem>>, %arg2: memref<1x32xf32, #tpu.memory_space<vmem>>, %arg3: memref<8x32xf32, #tpu.memory_space<vmem>>) attributes {dimension_semantics = [#tpu.dimension_semantics<parallel>], iteration_bounds = array<i64: 2>, scalar_prefetch = 0 : i64, scratch_operands = 0 : i64, tpu.core_type = #tpu.core_type<tc>, window_params = [{transform_indices = @transform_0, window_bounds = array<i64: 8, 32>}, {pipeline_mode = #tpu.pipeline_mode<synchronous>, transform_indices = @transform_1, window_bounds = array<i64: 1, 32>}, {transform_indices = @transform_2, window_bounds = array<i64: 8, 32>}]} {
    %c0 = arith.constant 0 : index
    %c0_0 = arith.constant 0 : index
    %0 = vector.load %arg1[%c0, %c0_0] : memref<8x32xf32, #tpu.memory_space<vmem>>, vector<8x32xf32>
    %1 = arith.mulf %0, %0 : vector<8x32xf32>
    %cst = arith.constant dense<0.000000e+00> : vector<8xf32>
    %2 = vector.multi_reduction <add>, %1, %cst [1] : vector<8x32xf32> to vector<8xf32>
    %3 = vector.shape_cast %2 : vector<8xf32> to vector<8x1xf32>
    %cst_1 = arith.constant 3.200000e+01 : f32
    %4 = vector.broadcast %cst_1 : f32 to vector<8x1xf32>
    %5 = arith.divf %3, %4 : vector<8x1xf32>
    %cst_2 = arith.constant 9.99999997E-7 : f32
    %6 = vector.broadcast %cst_2 : f32 to vector<8x1xf32>
    %7 = arith.addf %5, %6 : vector<8x1xf32>
    %8 = math.rsqrt %7 : vector<8x1xf32>
    %9 = vector.broadcast %8 : vector<8x1xf32> to vector<8x32xf32>
    %10 = arith.mulf %0, %9 : vector<8x32xf32>
    %c0_3 = arith.constant 0 : index
    %c0_4 = arith.constant 0 : index
    %11 = vector.load %arg2[%c0_3, %c0_4] : memref<1x32xf32, #tpu.memory_space<vmem>>, vector<1x32xf32>
    %12 = vector.broadcast %11 : vector<1x32xf32> to vector<8x32xf32>
    %13 = arith.mulf %12, %10 : vector<8x32xf32>
    %c0_5 = arith.constant 0 : index
    %c0_6 = arith.constant 0 : index
    %14 = vector.load %arg3[%c0_5, %c0_6] : memref<8x32xf32, #tpu.memory_space<vmem>>, vector<8x32xf32>
    tpu.vector_store %arg3[%c0_5, %c0_6], %13 {strides = array<i32>} : memref<8x32xf32, #tpu.memory_space<vmem>>, vector<8x32xf32>,
    return
  }
  func.func @transform_0(%arg0: i32) -> (i32, i32) {
    %c0_i32 = arith.constant 0 : i32
    %c0_i32_0 = arith.constant 0 : i32
    return %arg0, %c0_i32 : i32, i32
  }
  func.func @transform_1(%arg0: i32) -> (i32, i32) {
    %c0_i32 = arith.constant 0 : i32
    %c0_i32_0 = arith.constant 0 : i32
    %c0_i32_1 = arith.constant 0 : i32
    return %c0_i32, %c0_i32_0 : i32, i32
  }
  func.func @transform_2(%arg0: i32) -> (i32, i32) {
    %c0_i32 = arith.constant 0 : i32
    %c0_i32_0 = arith.constant 0 : i32
    return %arg0, %c0_i32 : i32, i32
  }
}

</mosaic_0001>

<bundles_post_ra>
// kernel: tpu_custom_call.1
= control target key start
LH: loop header
LB: loop body
LE: loop exit
PB: predicated region body
PF: predicated region fallthrough
CT: control target
= control target key end

     0   :  { %7 = vsyncpa [#allocation3], 0  ;;  %s581_s0 = inlined_call_operand.hbm [shape: f32[16,32], index: 0, kind: input, shape index: {}]   ;;  %s582_s1 = inlined_call_operand.vmem [shape: f32[1,32], index: 1, kind: input, shape index: {}]   ;;  %s583_s2 = inlined_call_operand.hbm [shape: f32[16,32], index: 2, kind: output, shape index: {}]  }
   0x1   :  { %9 = vsyncpa [#allocation3 + $0x1], 0 }
   0x2   :  { %10 = vsyncpa [#allocation4], 0 }
   0x3   :  { %12 = vsyncpa [#allocation4 + $0x1], 0  ;;  %s435_s9 = smov 0   ;;  %s437_s10 = smov 0  }
   0x4   :  { %s439_s11 = smov 0   ;;  %s441_s12 = smov 0  }
   0x5 LB: > { %s456_s13 = sadd.s32 4294967295, %s416_s12   ;;  %s263_s14 = sadd.s32 4294967294, %s416_s12   ;;  %s416_s12 = sphi %s441_s12, %s600_s12   ;;  %s412_s11 = sphi %s439_s11, %s599_s11   ;;  %s408_s10 = sphi %s437_s10, %s598_s10   ;;  %s404_s9 = sphi %s435_s9, %s597_s9  }
   0x6   : > { %s460_s15 = sadd.s32 1, %s416_s12   ;;  %s25_s16 = sadd.s32 1, %s412_s11 }
   0x7   : > { %s22_s17 = ssub.s32 %s416_s12, %s460_s15  ;;  %p32_p0 = scmp.ne.s32.totalorder %s412_s11, %s408_s10 }
   0x8   : > { %p23_p1 = scmp.eq.s32.totalorder %s22_s17, 0  ;;  %p33_p2 = scmp.eq.s32.totalorder %s416_s12, 0 }
   0x9   : > { %p38_p3 = scmp.ne.s32.totalorder %s408_s10, %s404_s9  ;;  %p39_p4 = scmp.eq.s32.totalorder %s456_s13, 0 }
   0xa   : > { %s472_s18 = scalar_select %p23_p1, %s412_s11, %s25_s16  }
   0xb   : > { %p474_p5 = por %p33_p2, %p32_p0  ;;  %p478_p6 = por %p39_p4, %p38_p3 }
   0xc   : > { %p83_p7 = scmp.eq.s32.totalorder %s456_s13, 1  ;;  %p89_p8 = scmp.eq.s32.totalorder %s263_s14, 1 }
   0xd   : > { %s587_s20 = scalar_select %p478_p6, 1, 0 }
   0xe   : > { %p288_p10 = scmp.lt.s32.totalorder %s416_s12, 2  ;;  %p485_p11 = por %p83_p7, %p32_p0 }
   0xf   : > { %p489_p12 = por %p89_p8, %p38_p3  ;;  %s112_s23 = sand.u32 1, %s412_s11  }
  0x10   : > { %s588_s21 = scalar_select %p485_p11, 1, 0 }
  0x11   : > { %s589_s22 = scalar_select %p489_p12, 1, 0 }
  0x12   : > { %s267_s24 = sshll.u32 %s416_s12, 7  ;;  %s266_s25 = sshll.u32 %s112_s23, 3 }
  0x13   : > { %s498_s28 = scalar_lea.hbm %s581_s0, %s267_s24  ;;  %s116_s29 = scalar_lea.vmem [#allocation2], %s266_s25 }
  0x14   : > { %s123_s30 = sshll.u32 %s116_s29, 4  ;;  %p502_p13 = pnand %p288_p10, %p474_p5  ;;  %s506_s30 = int_to_ptr.vmem [resolvable:$true] %s123_s30 }
  0x15   : > { %s113_s4 = scalar_lea.sflag [#allocation3], %s112_s23  ;;  %s324_s5 = scalar_lea.hbm %s498_s28, 128 }
  0x16   : > { %p325_p2 = scmp.ne.s32.totalorder %s498_s28, %s324_s5  ;;  %p326_p3 = pneg %p502_p13 }
  0x17   : > { %s329_s8 = scalar_lea.hbm %s581_s0, 256  ;;  %p330_p5 = scmp.lt.s32.totalorder %s498_s28, %s581_s0 }
  0x18   : > { %p327_p4 = pnand %p326_p3, %p325_p2  ;;  %p331_p8 = scmp.lt.s32.totalorder %s329_s8, %s324_s5 }
  0x1a   : > { %p328_p7 = pneg %p327_p4  ;;  %p332_p10 = por %p331_p8, %p330_p5 }
  0x1c   : > { %p333_p9 = pnand %p332_p10, %p328_p7 }
  0x1e   : > { %336 = shalt.err (!%p333_p9)
}
  0x1f   : > { %s337_s17 = scalar_lea.vmem %s506_s30, 128  ;;  %s418_s19 = smov [#allocation2]  }
  0x20   : > { %p338_p0 = scmp.ne.s32.totalorder %s506_s30, %s337_s17  ;;  %s342_s23 = sshll.u32 %s418_s19, 4  ;;  %s343_s23 = int_to_ptr.vmem [resolvable:$false] %s342_s23 }
  0x21   : > { %s344_s24 = scalar_lea.vmem %s343_s23, 256  ;;  %p345_p4 = scmp.lt.s32.totalorder %s506_s30, %s343_s23 }
  0x22   : > { %p340_p1 = pnand %p338_p0, %p326_p3  ;;  %p346_p12 = scmp.lt.s32.totalorder %s344_s24, %s337_s17 }
  0x24   : > { %p341_p2 = pneg %p340_p1  ;;  %p347_p11 = por %p346_p12, %p345_p4 }
  0x26   : > { %p348_p6 = pnand %p347_p11, %p341_p2 }
  0x28   : > { %351 = shalt.err (!%p348_p6)
}
  0x29   : > { %283 = dma.hbm_to_vmem [thread:$0]  (!%p502_p13), %s498_s28, 128, %s506_s30, %s113_s4  }
  0x2a   : > { %p591_p9 = scmp.lt.s32.totalorder %s416_s12, 3  ;;  %p592_p7 = scmp.ge.s32.totalorder %s416_s12, 1 }
  0x2c   : > { %p129_p0 = pnand %p592_p7, %p591_p9 }
  0x2d   : > { %s533_s25 = sand.u32 (!%p129_p0), 1, %s408_s10   ;;  %p593_p6 = scmp.ne.s32.totalorder (!%p129_p0), %s587_s20, 0 }
  0x2e   : > { %132 = sbr.rel (%p129_p0) target bundleno = 229 (0xe5), region = 28  ;;  %s269_s26 = sshll.u32 (!%p129_p0), %s533_s25, 3 }
  0x2f   : > { %s135_s27 = scalar_lea.sflag (!%p129_p0), [#allocation3], %s533_s25  ;;  %s138_s29 = scalar_lea.vmem (!%p129_p0), [#allocation2], %s269_s26 }
  0x33   : > { %395 = dma.done.wait (%p593_p6), %s135_s27, 128  }
  0x34   : > { %397 = vsyncadd (%p593_p6), %s135_s27, 4294967168  ;;  %v159_v0 = vld [vmem:[%s138_s29] sm:$0xff]  ;;  %vm161_vm0 = vcmask 261120   ;;  %s273_s20 = sshll.u32 %s456_s13, 7  ;;  %s158_s3 = scalar_lea.vmem [#allocation5], %s269_s26 }
  0x35   : > { %v160_v1 = vmul.f32 %v159_v0, %v159_v0  ;;  %v271_v7 = vld [vmem:[%s582_s1] ss:$0 sm:$0xff]  ;;  %s193_s4 = sshll.u32 %s158_s3, 4  ;;  %s191_s7 = scalar_lea.hbm %s583_s2, %s273_s20  ;;  %s194_s4 = int_to_ptr.vmem [resolvable:$true] %s193_s4 }
  0x36   : > { %s180_s8 = scalar_lea.sflag [#allocation4], %s533_s25  ;;  %s352_s14 = scalar_lea.vmem %s194_s4, 128 }
  0x37   : > { %v162_v2 = vsel %vm161_vm0, %v160_v1, 0.0  ;;  %p353_p11 = scmp.ne.s32.totalorder %s194_s4, %s352_s14  ;;  %p594_p12 = scmp.ne.s32.totalorder %s588_s21, 0 }
  0x38   : > { %163 = vadd.xlane.f32.xlu0 %v162_v2  ;;  %s419_s16 = smov [#allocation5]  }
  0x39   : > { %p354_p13 = pnand %p353_p11, %p594_p12  ;;  %s356_s17 = sshll.u32 %s419_s16, 4  ;;  %s357_s17 = int_to_ptr.vmem [resolvable:$false] %s356_s17 }
  0x3a   : > { %s358_s13 = scalar_lea.vmem %s357_s17, 256  ;;  %p359_p3 = scmp.lt.s32.totalorder %s194_s4, %s357_s17 }
  0x3b   : > { %p355_p1 = pneg %p354_p13  ;;  %p360_p5 = scmp.lt.s32.totalorder %s358_s13, %s352_s14 }
  0x3d   : > { %p361_p8 = por %p360_p5, %p359_p3 }
  0x3f   : > { %p362_p10 = pnand %p361_p8, %p355_p1 }
  0xc1   : > { %v164_v3 = vpop.xlane.xlu0 %163 }
  0xc2   : > { %v166_v4 = vmul.f32 0.03125, %v164_v3 }
  0xc4   : > { %v167_v5 = vadd.f32 1e-06, %v166_v4 }
  0xc6   : > { %322 = vrsqrt.f32 %v167_v5 }
  0xd3   : > { %v323_v6 = vpop.eup %322 }
  0xd4   : > { %v169_v8 = vmul.f32 %v323_v6, %v159_v0 }
  0xd6   : > { %v177_v9 = vmul.f32 %v271_v7, %v169_v8 }
  0xd8   : > { %178 = vst.msk [vmem:[%s158_s3] sm:$0xff] %vm161_vm0, %v177_v9 }
  0xd9   : > { %365 = shalt.err (!%p362_p10)
}
  0xda   : > { %s366_s19 = scalar_lea.hbm %s191_s7, 128  ;;  %s370_s25 = scalar_lea.hbm %s583_s2, 256 }
  0xdb   : > { %p367_p2 = scmp.ne.s32.totalorder %s191_s7, %s366_s19  ;;  %p371_p7 = scmp.lt.s32.totalorder %s191_s7, %s583_s2 }
  0xdc   : > { %p372_p0 = scmp.lt.s32.totalorder %s370_s25, %s366_s19 }
  0xdd   : > { %p368_p4 = pnand %p367_p2, %p594_p12 }
  0xde   : > { %p373_p6 = por %p372_p0, %p371_p7 }
  0xdf   : > { %p369_p9 = pneg %p368_p4 }
  0xe1   : > { %p374_p11 = pnand %p373_p6, %p369_p9 }
  0xe3   : > { %377 = shalt.err (!%p374_p11)
}
  0xe4   : > { %278 = dma.vmem_to_hbm [thread:$0]  (%p594_p12), %s194_s4, 128, %s191_s7, %s180_s8  }
  0xe5 PF: > { %s205_s29 = sand.u32 1, %s404_s9   ;;  %p595_p13 = scmp.ne.s32.totalorder %s589_s22, 0 }
  0xe6   : > { %p596_p1 = scmp.ge.s32.totalorder %s416_s12, 2  ;;  %s206_s28 = scalar_lea.sflag [#allocation4], %s205_s29 }
  0xe8   : > { %p285_p3 = pnand %p596_p1, %p595_p13 }
  0xea   : > { %p286_p5 = pneg %p285_p3 }
  0xec   : > { %399 = dma.done.wait (%p286_p5), %s206_s28, 128  }
  0xed   : > { %401 = vsyncadd (%p286_p5), %s206_s28, 4294967168  ;;  %p15_p8 = scmp.ge.s32.totalorder %s460_s15, 4   ;;  %s597_s9 = smov %s408_s10 }
  0xee   : > { %s598_s10 = smov %s412_s11  ;;  %s599_s11 = smov %s472_s18 }
  0xef   : > { %s600_s12 = smov %s460_s15  ;;  %17 = sbr.rel (!%p15_p8) target bundleno = 5 (0x5), region = 73 }
  0xf4   :  { %211 = vsyncpa [#allocation3], 1 }
  0xf5   :  { %213 = vsyncpa [#allocation3 + $0x1], 1 }
  0xf6   :  { %214 = vsyncpa [#allocation4], 1 }
  0xf7   :  { %216 = vsyncpa [#allocation4 + $0x1], 1 }

</bundles_post_ra>
